<compile_context>
chip_gen: v7x
topology: tpu7x:2x2x1
jax: 0.10.0
libtpu: 0.0.40
codegen_flags: <defaults>
</compile_context>

<pallas_src>
import jax
import jax.numpy as jnp
from jax.experimental import pallas as pl
from jax.experimental.pallas import tpu as pltpu


def _round_up(x, m):
    return ((x + m - 1) // m) * m


def mlp_kernel(x_ref, w1_ref, b1_ref, w2_ref, b2_ref, w3_ref, b3_ref,
               o_ref, acc_ref):
    k = pl.program_id(0)

    @pl.when(k == 0)
    def _init():
        acc_ref[...] = jnp.zeros_like(acc_ref)

    # Layer 1 partial product for this K tile (bf16 inputs, f32 accumulate).
    acc_ref[...] += jnp.dot(x_ref[...], w1_ref[...],
                            preferred_element_type=jnp.float32)

    @pl.when(k == pl.num_programs(0) - 1)
    def _finish():
        # Bias + ReLU only after the full K reduction.
        h1 = jnp.maximum(acc_ref[...] + b1_ref[...], 0.0)
        # Layer 2: h1 @ W2 + b2, ReLU   (tiny, stays resident in VMEM)
        h2 = jnp.dot(h1, w2_ref[...], preferred_element_type=jnp.float32)
        h2 = jnp.maximum(h2 + b2_ref[...], 0.0)
        # Output layer: h2 @ W3 + b3, sigmoid
        logits = jnp.dot(h2, w3_ref[...],
                         preferred_element_type=jnp.float32) + b3_ref[...]
        o_ref[...] = jax.nn.sigmoid(logits).astype(o_ref.dtype)


def mlp_forward(x, w1, b1, w2, b2, w3, b3, *, tk=2048):
    """x: (B, IN). Weights already transposed to (in, out) layout.

    Streams x/W1 in bf16 over a K-tiled reduction grid; f32 accumulation.
    """
    B, IN = x.shape
    H1 = w1.shape[1]
    H2 = w2.shape[1]
    OUT = w3.shape[1]

    # Stream the big layer-1 operands in bf16 (halves HBM bytes for W1).
    x = x.astype(jnp.bfloat16)
    w1 = w1.astype(jnp.bfloat16)
    b1 = b1.astype(jnp.float32)
    w2 = w2.astype(jnp.float32)
    b2 = b2.astype(jnp.float32)
    w3 = w3.astype(jnp.float32)
    b3 = b3.astype(jnp.float32)

    # K tile: multiple of 128 (it is the lane dim of the x block). Pad K with
    # zeros so every tile is full-width and rectangular.
    tk = min(tk, _round_up(IN, 128))
    in_pad = _round_up(IN, tk)
    if in_pad != IN:
        x = jnp.pad(x, ((0, 0), (0, in_pad - IN)))
        w1 = jnp.pad(w1, ((0, in_pad - IN), (0, 0)))
    n_k = in_pad // tk

    return pl.pallas_call(
        mlp_kernel,
        out_shape=jax.ShapeDtypeStruct((B, OUT), jnp.float32),
        grid=(n_k,),
        in_specs=[
            pl.BlockSpec((B, tk), lambda k: (0, k)),     # x   : stream K tiles
            pl.BlockSpec((tk, H1), lambda k: (k, 0)),    # W1  : stream K tiles
            pl.BlockSpec((1, H1), lambda k: (0, 0)),     # b1  : resident
            pl.BlockSpec((H1, H2), lambda k: (0, 0)),    # W2  : resident
            pl.BlockSpec((1, H2), lambda k: (0, 0)),     # b2  : resident
            pl.BlockSpec((H2, OUT), lambda k: (0, 0)),   # W3  : resident
            pl.BlockSpec((1, OUT), lambda k: (0, 0)),    # b3  : resident
        ],
        out_specs=pl.BlockSpec((B, OUT), lambda k: (0, 0)),
        scratch_shapes=[pltpu.VMEM((B, H1), jnp.float32)],
        compiler_params=pltpu.CompilerParams(
            dimension_semantics=("arbitrary",),
            vmem_limit_bytes=32 << 20,
        ),
    )(x, w1, b1, w2, b2, w3, b3)


def init_params(key, input_features, hidden1, hidden2, output_features):
    """Deterministic init mirroring nn.Linear shapes (stored pre-transposed)."""
    ks = jax.random.split(key, 6)

    def lin(kw, kb, fan_in, fan_out):
        bound = 1.0 / jnp.sqrt(fan_in)
        w = jax.random.uniform(kw, (fan_in, fan_out), jnp.float32, -bound, bound)
        b = jax.random.uniform(kb, (1, fan_out), jnp.float32, -bound, bound)
        return w, b

    w1, b1 = lin(ks[0], ks[1], input_features, hidden1)
    w2, b2 = lin(ks[2], ks[3], hidden1, hidden2)
    w3, b3 = lin(ks[4], ks[5], hidden2, output_features)
    return w1, b1, w2, b2, w3, b3


if __name__ == "__main__":
    # Small shapes consistent with the module: hidden1=256, hidden2=32, out=1.
    # input_features shrunk from 50000 -> 2048 for the synthetic run; with
    # tk=512 this exercises a 4-step K reduction (same structure used at
    # IN=50000, where tk=2048 gives 25 pipelined W1-streaming steps).
    B, IN, H1, H2, OUT = 8, 2048, 256, 32, 1
    TK = 512

    key = jax.random.PRNGKey(0)
    kx, kp = jax.random.split(key)
    x = jax.random.normal(kx, (B, IN), jnp.float32)
    params = init_params(kp, IN, H1, H2, OUT)

    out = mlp_forward(x, *params, tk=TK)
    out = jax.block_until_ready(out)

    # Cross-check against a pure-JAX reference of the same forward pass,
    # using the same bf16-cast layer-1 operands the kernel streams.
    w1, b1, w2, b2, w3, b3 = params
    x_bf = x.astype(jnp.bfloat16).astype(jnp.float32)
    w1_bf = w1.astype(jnp.bfloat16).astype(jnp.float32)
    h1 = jnp.maximum(x_bf @ w1_bf + b1, 0.0)
    h2 = jnp.maximum(h1 @ w2 + b2, 0.0)
    ref = jax.nn.sigmoid(h2 @ w3 + b3)

    assert out.shape == (B, OUT)
    assert jnp.allclose(out, ref, atol=1e-3, rtol=1e-3), (
        f"max abs err {jnp.max(jnp.abs(out - ref))}")

    print("KERNEL_OK")
</pallas_src>

<mosaic_0001>
module attributes {stable_mosaic.version = 11 : i64} {
  func.func @mlp_kernel(%arg0: i32, %arg1: memref<8x512xbf16, #tpu.memory_space<vmem>>, %arg2: memref<512x256xbf16, #tpu.memory_space<vmem>>, %arg3: memref<1x256xf32, #tpu.memory_space<vmem>>, %arg4: memref<256x32xf32, #tpu.memory_space<vmem>>, %arg5: memref<1x32xf32, #tpu.memory_space<vmem>>, %arg6: memref<32x1xf32, #tpu.memory_space<vmem>>, %arg7: memref<1x1xf32, #tpu.memory_space<vmem>>, %arg8: memref<8x1xf32, #tpu.memory_space<vmem>>, %arg9: memref<8x256xf32, #tpu.memory_space<vmem>>) attributes {dimension_semantics = [#tpu.dimension_semantics<arbitrary>], iteration_bounds = array<i64: 4>, scalar_prefetch = 0 : i64, scratch_operands = 1 : i64, tpu.core_type = #tpu.core_type<tc>, window_params = [{transform_indices = @transform_0, window_bounds = array<i64: 8, 512>}, {transform_indices = @transform_1, window_bounds = array<i64: 512, 256>}, {pipeline_mode = #tpu.pipeline_mode<synchronous>, transform_indices = @transform_2, window_bounds = array<i64: 1, 256>}, {pipeline_mode = #tpu.pipeline_mode<synchronous>, transform_indices = @transform_3, window_bounds = array<i64: 256, 32>}, {pipeline_mode = #tpu.pipeline_mode<synchronous>, transform_indices = @transform_4, window_bounds = array<i64: 1, 32>}, {pipeline_mode = #tpu.pipeline_mode<synchronous>, transform_indices = @transform_5, window_bounds = array<i64: 32, 1>}, {pipeline_mode = #tpu.pipeline_mode<synchronous>, transform_indices = @transform_6, window_bounds = array<i64: 1, 1>}, {pipeline_mode = #tpu.pipeline_mode<synchronous>, transform_indices = @transform_7, window_bounds = array<i64: 8, 1>}]} {
    %c0_i32 = arith.constant 0 : i32
    %0 = arith.cmpi eq, %arg0, %c0_i32 : i32
    %1 = arith.extui %0 : i1 to i32
    %c0_i32_0 = arith.constant 0 : i32
    %2 = arith.cmpi ne, %1, %c0_i32_0 : i32
    scf.if %2 {
      %cst_9 = arith.constant 0.000000e+00 : f32
      %12 = vector.broadcast %cst_9 : f32 to vector<8x256xf32>
      %c0_10 = arith.constant 0 : index
      %c0_11 = arith.constant 0 : index
      %13 = vector.load %arg9[%c0_10, %c0_11] : memref<8x256xf32, #tpu.memory_space<vmem>>, vector<8x256xf32>
      tpu.vector_store %arg9[%c0_10, %c0_11], %12 {strides = array<i32>} : memref<8x256xf32, #tpu.memory_space<vmem>>, vector<8x256xf32>,
    } else {
    }
    %c0 = arith.constant 0 : index
    %c0_1 = arith.constant 0 : index
    %3 = vector.load %arg9[%c0, %c0_1] : memref<8x256xf32, #tpu.memory_space<vmem>>, vector<8x256xf32>
    %c0_2 = arith.constant 0 : index
    %c0_3 = arith.constant 0 : index
    %4 = vector.load %arg1[%c0_2, %c0_3] : memref<8x512xbf16, #tpu.memory_space<vmem>>, vector<8x512xbf16>
    %c0_4 = arith.constant 0 : index
    %c0_5 = arith.constant 0 : index
    %5 = vector.load %arg2[%c0_4, %c0_5] : memref<512x256xbf16, #tpu.memory_space<vmem>>, vector<512x256xbf16>
    %cst = arith.constant dense<0.000000e+00> : vector<8x256xf32>
    %6 = tpu.matmul %4, %5, %cst {dimension_numbers = #tpu.dot_dimension_numbers<[1], [0], [0], [1], [0, 0, 1, 1], [], []>} : vector<8x512xbf16>, vector<512x256xbf16>, vector<8x256xf32> -> vector<8x256xf32>
    %7 = arith.addf %3, %6 : vector<8x256xf32>
    %c0_6 = arith.constant 0 : index
    %c0_7 = arith.constant 0 : index
    %8 = vector.load %arg9[%c0_6, %c0_7] : memref<8x256xf32, #tpu.memory_space<vmem>>, vector<8x256xf32>
    tpu.vector_store %arg9[%c0_6, %c0_7], %7 {strides = array<i32>} : memref<8x256xf32, #tpu.memory_space<vmem>>, vector<8x256xf32>,
    %c3_i32 = arith.constant 3 : i32
    %9 = arith.cmpi eq, %arg0, %c3_i32 : i32
    %10 = arith.extui %9 : i1 to i32
    %c0_i32_8 = arith.constant 0 : i32
    %11 = arith.cmpi ne, %10, %c0_i32_8 : i32
    scf.if %11 {
      %c0_9 = arith.constant 0 : index
      %c0_10 = arith.constant 0 : index
      %12 = vector.load %arg9[%c0_9, %c0_10] : memref<8x256xf32, #tpu.memory_space<vmem>>, vector<8x256xf32>
      %c0_11 = arith.constant 0 : index
      %c0_12 = arith.constant 0 : index
      %13 = vector.load %arg3[%c0_11, %c0_12] : memref<1x256xf32, #tpu.memory_space<vmem>>, vector<1x256xf32>
      %14 = vector.broadcast %13 : vector<1x256xf32> to vector<8x256xf32>
      %15 = arith.addf %12, %14 : vector<8x256xf32>
      %cst_13 = arith.constant 0.000000e+00 : f32
      %16 = vector.broadcast %cst_13 : f32 to vector<8x256xf32>
      %17 = arith.maximumf %15, %16 : vector<8x256xf32>
      %c0_14 = arith.constant 0 : index
      %c0_15 = arith.constant 0 : index
      %18 = vector.load %arg4[%c0_14, %c0_15] : memref<256x32xf32, #tpu.memory_space<vmem>>, vector<256x32xf32>
      %cst_16 = arith.constant dense<0.000000e+00> : vector<8x32xf32>
      %19 = tpu.matmul %17, %18, %cst_16 {dimension_numbers = #tpu.dot_dimension_numbers<[1], [0], [0], [1], [0, 0, 1, 1], [], []>} : vector<8x256xf32>, vector<256x32xf32>, vector<8x32xf32> -> vector<8x32xf32>
      %c0_17 = arith.constant 0 : index
      %c0_18 = arith.constant 0 : index
      %20 = vector.load %arg5[%c0_17, %c0_18] : memref<1x32xf32, #tpu.memory_space<vmem>>, vector<1x32xf32>
      %21 = vector.broadcast %20 : vector<1x32xf32> to vector<8x32xf32>
      %22 = arith.addf %19, %21 : vector<8x32xf32>
      %cst_19 = arith.constant 0.000000e+00 : f32
      %23 = vector.broadcast %cst_19 : f32 to vector<8x32xf32>
      %24 = arith.maximumf %22, %23 : vector<8x32xf32>
      %c0_20 = arith.constant 0 : index
      %c0_21 = arith.constant 0 : index
      %25 = vector.load %arg6[%c0_20, %c0_21] : memref<32x1xf32, #tpu.memory_space<vmem>>, vector<32x1xf32>
      %cst_22 = arith.constant dense<0.000000e+00> : vector<8x1xf32>
      %26 = tpu.matmul %24, %25, %cst_22 {dimension_numbers = #tpu.dot_dimension_numbers<[1], [0], [0], [1], [0, 0, 1, 1], [], []>} : vector<8x32xf32>, vector<32x1xf32>, vector<8x1xf32> -> vector<8x1xf32>
      %c0_23 = arith.constant 0 : index
      %c0_24 = arith.constant 0 : index
      %27 = vector.load %arg7[%c0_23, %c0_24] : memref<1x1xf32, #tpu.memory_space<vmem>>, vector<1x1xf32>
      %28 = vector.broadcast %27 : vector<1x1xf32> to vector<8x1xf32>
      %29 = arith.addf %26, %28 : vector<8x1xf32>
      %30 = arith.negf %29 : vector<8x1xf32>
      %31 = math.exp %30 : vector<8x1xf32>
      %cst_25 = arith.constant 1.000000e+00 : f32
      %32 = vector.broadcast %cst_25 : f32 to vector<8x1xf32>
      %33 = arith.addf %32, %31 : vector<8x1xf32>
      %34 = arith.divf %32, %33 : vector<8x1xf32>
      %c0_26 = arith.constant 0 : index
      %c0_27 = arith.constant 0 : index
      %35 = vector.load %arg8[%c0_26, %c0_27] : memref<8x1xf32, #tpu.memory_space<vmem>>, vector<8x1xf32>
      tpu.vector_store %arg8[%c0_26, %c0_27], %34 {strides = array<i32>} : memref<8x1xf32, #tpu.memory_space<vmem>>, vector<8x1xf32>,
    } else {
    }
    return
  }
  func.func @transform_0(%arg0: i32) -> (i32, i32) {
    %c0_i32 = arith.constant 0 : i32
    %c0_i32_0 = arith.constant 0 : i32
    return %c0_i32, %arg0 : i32, i32
  }
  func.func @transform_1(%arg0: i32) -> (i32, i32) {
    %c0_i32 = arith.constant 0 : i32
    %c0_i32_0 = arith.constant 0 : i32
    return %arg0, %c0_i32 : i32, i32
  }
  func.func @transform_2(%arg0: i32) -> (i32, i32) {
    %c0_i32 = arith.constant 0 : i32
    %c0_i32_0 = arith.constant 0 : i32
    %c0_i32_1 = arith.constant 0 : i32
    return %c0_i32, %c0_i32_0 : i32, i32
  }
  func.func @transform_3(%arg0: i32) -> (i32, i32) {
    %c0_i32 = arith.constant 0 : i32
    %c0_i32_0 = arith.constant 0 : i32
    %c0_i32_1 = arith.constant 0 : i32
    return %c0_i32, %c0_i32_0 : i32, i32
  }
  func.func @transform_4(%arg0: i32) -> (i32, i32) {
    %c0_i32 = arith.constant 0 : i32
    %c0_i32_0 = arith.constant 0 : i32
    %c0_i32_1 = arith.constant 0 : i32
    return %c0_i32, %c0_i32_0 : i32, i32
  }
  func.func @transform_5(%arg0: i32) -> (i32, i32) {
    %c0_i32 = arith.constant 0 : i32
    %c0_i32_0 = arith.constant 0 : i32
    %c0_i32_1 = arith.constant 0 : i32
    return %c0_i32, %c0_i32_0 : i32, i32
  }
  func.func @transform_6(%arg0: i32) -> (i32, i32) {
    %c0_i32 = arith.constant 0 : i32
    %c0_i32_0 = arith.constant 0 : i32
    %c0_i32_1 = arith.constant 0 : i32
    return %c0_i32, %c0_i32_0 : i32, i32
  }
  func.func @transform_7(%arg0: i32) -> (i32, i32) {
    %c0_i32 = arith.constant 0 : i32
    %c0_i32_0 = arith.constant 0 : i32
    %c0_i32_1 = arith.constant 0 : i32
    return %c0_i32, %c0_i32_0 : i32, i32
  }
}

</mosaic_0001>

<bundles_post_ra>
// kernel: tpu_custom_call.1
= control target key start
LH: loop header
LB: loop body
LE: loop exit
PB: predicated region body
PF: predicated region fallthrough
CT: control target
= control target key end

     0   :  { %s1819_s0 = inlined_call_operand.vmem [shape: bf16[8,2048], index: 0, kind: input, shape index: {}]   ;;  %s1820_s1 = inlined_call_operand.hbm [shape: bf16[2048,256], index: 1, kind: input, shape index: {}]   ;;  %s1821_s2 = inlined_call_operand.vmem [shape: f32[1,256], index: 2, kind: input, shape index: {}]   ;;  %s1822_s3 = inlined_call_operand.vmem [shape: f32[256,32], index: 3, kind: input, shape index: {}]   ;;  %s1823_s4 = inlined_call_operand.vmem [shape: f32[1,32], index: 4, kind: input, shape index: {}]   ;;  %s1824_s5 = inlined_call_operand.vmem [shape: f32[32,1], index: 5, kind: input, shape index: {}]   ;;  %s1825_s6 = inlined_call_operand.<no memory space> [shape: f32[1,1], index: 6, kind: input, shape index: {}]   ;;  %s1826_s7 = inlined_call_operand.vmem [shape: f32[8,1], index: 7, kind: output, shape index: {}]  }
   0x1   :  { %v12_v0 = vstv %s1825_s6 }
   0x2   :  { %13 = vst [vmem:[#allocation3] sm:$0x1] %v12_v0 }
   0x3   :  { %14 = vsyncpa [#allocation5], 0 }
   0x4   :  { %16 = vsyncpa [#allocation5 + $0x1], 0  ;;  %s1523_s26 = smov 0   ;;  %s1525_s27 = smov 0  }
   0x5   :  { %s1527_s28 = smov 0   ;;  %s1529_s29 = smov 0  }
   0x6 LB: > { %s1542_s6 = sadd.s32 4294967295, %s1471_s29   ;;  %s1545_s30 = sadd.s32 1, %s1471_s29   ;;  %s1471_s29 = sphi %s1529_s29, %s1833_s29   ;;  %s1467_s28 = sphi %s1527_s28, %s1832_s28   ;;  %s1463_s27 = sphi %s1525_s27, %s1831_s27   ;;  %s1459_s26 = sphi %s1523_s26, %s1830_s26  }
   0x7   : > { %s52_s8 = ssub.s32 %s1471_s29, %s1545_s30  ;;  %s55_s9 = sadd.s32 1, %s1467_s28 }
   0x8   : > { %p53_p0 = scmp.eq.s32.totalorder %s52_s8, 0  ;;  %p62_p1 = scmp.ne.s32.totalorder %s1467_s28, %s1463_s27 }
   0x9   : > { %p63_p2 = scmp.eq.s32.totalorder %s1471_s29, 0  ;;  %p68_p3 = scmp.ne.s32.totalorder %s1463_s27, %s1459_s26 }
   0xa   : > { %s1555_s10 = scalar_select %p53_p0, %s1467_s28, %s55_s9  }
   0xb   : > { %p64_p4 = por %p63_p2, %p62_p1  ;;  %p69_p5 = scmp.eq.s32.totalorder %s1542_s6, 0 }
   0xc   : > { %p1264_p6 = scmp.lt.s32.totalorder %s1471_s29, 4  ;;  %s242_s12 = sand.u32 1, %s1467_s28  }
   0xd   : > { %p1559_p7 = por %p69_p5, %p68_p3  ;;  %s1083_s13 = sshll.u32 %s242_s12, 9 }
   0xe   : > { %s1168_s14 = sshll.u32 %s1471_s29, 13  ;;  %s246_s18 = scalar_lea.vmem [#allocation4], %s1083_s13 }
   0xf   : > { %s1568_s17 = scalar_lea.hbm %s1820_s1, %s1168_s14  ;;  %s254_s19 = sshll.u32 %s246_s18, 4  ;;  %s1570_s19 = int_to_ptr.vmem [resolvable:$true] %s254_s19 }
  0x10   : > { %p1572_p8 = pnand %p1264_p6, %p64_p4  ;;  %s1577_s21 = scalar_lea.sflag [#allocation5], %s242_s12 }
  0x11   : > { %s1407_s22 = scalar_lea.hbm %s1568_s17, 8192  ;;  %s1412_s25 = scalar_lea.hbm %s1820_s1, 32768 }
  0x12   : > { %p1408_p10 = scmp.ne.s32.totalorder %s1568_s17, %s1407_s22  ;;  %p1409_p11 = pneg %p1572_p8 }
  0x13   : > { %p1413_p0 = scmp.lt.u32.totalorder %s1568_s17, %s1820_s1  ;;  %p1414_p1 = scmp.lt.u32.totalorder %s1412_s25, %s1407_s22 }
  0x14   : > { %p1410_p12 = pnand %p1409_p11, %p1408_p10  ;;  %p1416_p3 = scmp.lt.u32.totalorder %s1407_s22, %s1568_s17 }
  0x15   : > { %p1415_p2 = por %p1414_p1, %p1413_p0 }
  0x16   : > { %p1411_p13 = pneg %p1410_p12 }
  0x17   : > { %p1417_p4 = por %p1416_p3, %p1415_p2 }
  0x19   : > { %p1418_p5 = pnand %p1417_p4, %p1411_p13 }
  0x1b   : > { %1421 = shalt.err (!%p1418_p5)
}
  0x1c   : > { %s1422_s9 = scalar_lea.vmem %s1570_s19, 8192  ;;  %s1473_s12 = smov [#allocation4]  }
  0x1d   : > { %p1423_p6 = scmp.ne.s32.totalorder %s1570_s19, %s1422_s9  ;;  %s1427_s13 = sshll.u32 %s1473_s12, 4  ;;  %s1428_s13 = int_to_ptr.vmem [resolvable:$false] %s1427_s13 }
  0x1e   : > { %s1429_s14 = scalar_lea.vmem %s1428_s13, 16384  ;;  %p1430_p9 = scmp.lt.s32.totalorder %s1570_s19, %s1428_s13 }
  0x1f   : > { %p1425_p10 = pnand %p1423_p6, %p1409_p11  ;;  %p1431_p0 = scmp.lt.s32.totalorder %s1429_s14, %s1422_s9 }
  0x21   : > { %p1426_p12 = pneg %p1425_p10  ;;  %p1432_p1 = por %p1431_p0, %p1430_p9 }
  0x23   : > { %p1433_p2 = pnand %p1432_p1, %p1426_p12 }
  0x25   : > { %1436 = shalt.err (!%p1433_p2)
}
  0x26   : > { %s1474_s15 = smov 128   ;;  %s1475_s16 = smov 8  }
  0x27   : > { %1263 = dma.hbm_to_vmem [thread:$0]  (!%p1572_p8), %s1568_s17, 8192, %s1570_s19, %s1577_s21, %s1474_s15, %s1474_s15, %s1475_s16  }
  0x28   : > { %p262_p11 = scmp.lt.s32.totalorder %s1471_s29, 5  ;;  %p1829_p13 = scmp.ge.s32.totalorder %s1471_s29, 1 }
  0x2a   : > { %p263_p3 = pnand %p1829_p13, %p262_p11 }
  0x2b   : > { %s268_s18 = sand.u32 (!%p263_p3), 1, %s1463_s27  }
  0x2c   : > { %266 = sbr.rel (%p263_p3) target bundleno = 817 (0x331), region = 48  ;;  %s1088_s22 = sshll.u32 (!%p263_p3), %s268_s18, 9 }
  0x2d   : > { %s269_s23 = scalar_lea.sflag (!%p263_p3), [#allocation5], %s268_s18  ;;  %s1609_s24 = scalar_lea.vmem (!%p263_p3), [#allocation4], %s1088_s22 }
  0x33   : > { %1454 = dma.done.wait (%p1559_p7), %s269_s23, 8192  }
  0x34   : > { %1456 = vsyncadd (%p1559_p7), %s269_s23, 4294959104  ;;  %s1089_s25 = sshll.u32 %s1542_s6, 2  ;;  %p1091_p8 = scmp.ne.s32.totalorder %s1542_s6, 0 }
  0x35   : > { %p304_p9 = scmp.lt.s32.totalorder %s1089_s25, 15  ;;  %v1476_v1 = vmov (!%p1091_p8), 0.0  }
  0x36   : > { %313 = sbr.rel (%p1091_p8) target bundleno = 61 (0x3d), region = 56  ;;  %314 = vst [vmem:[#allocation2] sm:$0xff] (!%p1091_p8), %v1476_v1  ;;  %315 = vst [vmem:[#allocation2 + $0x8] sm:$0xff] (!%p1091_p8), %v1476_v1 }
  0x37   : > { %s1835_s25 = smov (!%p304_p9, %s1089_s25), 15 }
  0x38   : > { %s1090_s17 = sshll.u32 %s1835_s25, 2 }
  0x39   : > { %s1619_s20 = scalar_lea.vmem %s1819_s0, %s1090_s17 }
  0x3d PF: > { %v1303_v2 = vld [vmem:[%s1609_s24 + $0x4] ss:$8 sps:$4 sm:$0xff]   ;;  %v1307_v4 = vld [vmem:[%s1609_s24] ss:$8 sps:$4 sm:$0xff]   ;;  %v1309_v6 = vld [vmem:[%s1609_s24 + $0x14] ss:$8 sps:$4 sm:$0xff]  }
  0x3e   : > { %v1305_v3 = vld [vmem:[%s1609_s24 + $0x104] ss:$8 sps:$4 sm:$0xff]   ;;  %718 = vmatprep.subr.bf16.mxu0 %v1303_v2  ;;  %v1308_v5 = vld [vmem:[%s1609_s24 + $0x100] ss:$8 sps:$4 sm:$0xff]   ;;  %v1311_v7 = vld [vmem:[%s1609_s24 + $0x114] ss:$8 sps:$4 sm:$0xff]  }
  0x3f   : > { %759 = vmatprep.subr.bf16.mxu1 %v1305_v3  ;;  %719 = vmatpush1.bf16.msra.mxu0 %v1307_v4  ;;  %v1313_v8 = vld [vmem:[%s1609_s24 + $0x10] ss:$8 sps:$4 sm:$0xff]   ;;  %v1315_v10 = vld [vmem:[%s1609_s24 + $0x24] ss:$8 sps:$4 sm:$0xff]   ;;  %v1319_v12 = vld [vmem:[%s1609_s24 + $0x20] ss:$8 sps:$4 sm:$0xff]  }
  0x40   : > { %760 = vmatpush1.bf16.msra.mxu1 %v1308_v5  ;;  %720 = vmatprep.subr.bf16.mxu0 %v1309_v6  ;;  %v1314_v9 = vld [vmem:[%s1609_s24 + $0x110] ss:$8 sps:$4 sm:$0xff]   ;;  %v1317_v11 = vld [vmem:[%s1609_s24 + $0x124] ss:$8 sps:$4 sm:$0xff]   ;;  %v1320_v13 = vld [vmem:[%s1609_s24 + $0x120] ss:$8 sps:$4 sm:$0xff]  }
  0x41   : > { %761 = vmatprep.subr.bf16.mxu1 %v1311_v7  ;;  %v1321_v14 = vld [vmem:[%s1609_s24 + $0x34] ss:$8 sps:$4 sm:$0xff]   ;;  %v1325_v16 = vld [vmem:[%s1609_s24 + $0x30] ss:$8 sps:$4 sm:$0xff]   ;;  %v1327_v18 = vld [vmem:[%s1609_s24 + $0x44] ss:$8 sps:$4 sm:$0xff]  }
  0x42   : > { %v1323_v15 = vld [vmem:[%s1609_s24 + $0x134] ss:$8 sps:$4 sm:$0xff]   ;;  %v1326_v17 = vld [vmem:[%s1609_s24 + $0x130] ss:$8 sps:$4 sm:$0xff]   ;;  %v1329_v19 = vld [vmem:[%s1609_s24 + $0x144] ss:$8 sps:$4 sm:$0xff]  }
  0x43   : > { %721 = vmatpush1.bf16.msra.mxu0 %v1313_v8  ;;  %v1331_v20 = vld [vmem:[%s1609_s24 + $0x40] ss:$8 sps:$4 sm:$0xff]   ;;  %v1333_v22 = vld [vmem:[%s1609_s24 + $0x54] ss:$8 sps:$4 sm:$0xff]   ;;  %v1337_v24 = vld [vmem:[%s1609_s24 + $0x50] ss:$8 sps:$4 sm:$0xff]  }
  0x44   : > { %762 = vmatpush1.bf16.msra.mxu1 %v1314_v9  ;;  %722 = vmatprep.subr.bf16.mxu0 %v1315_v10  ;;  %v1332_v21 = vld [vmem:[%s1609_s24 + $0x140] ss:$8 sps:$4 sm:$0xff]   ;;  %v1335_v23 = vld [vmem:[%s1609_s24 + $0x154] ss:$8 sps:$4 sm:$0xff]   ;;  %v1338_v25 = vld [vmem:[%s1609_s24 + $0x150] ss:$8 sps:$4 sm:$0xff]  }
  0x45   : > { %763 = vmatprep.subr.bf16.mxu1 %v1317_v11  ;;  %v1339_v26 = vld [vmem:[%s1609_s24 + $0x64] ss:$8 sps:$4 sm:$0xff]   ;;  %v1343_v28 = vld [vmem:[%s1609_s24 + $0x60] ss:$8 sps:$4 sm:$0xff]   ;;  %v1345_v30 = vld [vmem:[%s1609_s24 + $0x74] ss:$8 sps:$4 sm:$0xff]  }
  0x46   : > { %v1341_v27 = vld [vmem:[%s1609_s24 + $0x164] ss:$8 sps:$4 sm:$0xff]   ;;  %v1344_v29 = vld [vmem:[%s1609_s24 + $0x160] ss:$8 sps:$4 sm:$0xff]   ;;  %v1347_v31 = vld [vmem:[%s1609_s24 + $0x174] ss:$8 sps:$4 sm:$0xff]  }
  0x47   : > { %723 = vmatpush1.bf16.msra.mxu0 %v1319_v12  ;;  %v1349_v32 = vld [vmem:[%s1609_s24 + $0x70] ss:$8 sps:$4 sm:$0xff]   ;;  %v1351_v34 = vld [vmem:[%s1609_s24 + $0x84] ss:$8 sps:$4 sm:$0xff]   ;;  %v1355_v36 = vld [vmem:[%s1609_s24 + $0x80] ss:$8 sps:$4 sm:$0xff]  }
  0x48   : > { %764 = vmatpush1.bf16.msra.mxu1 %v1320_v13  ;;  %724 = vmatprep.subr.bf16.mxu0 %v1321_v14  ;;  %v1350_v33 = vld [vmem:[%s1609_s24 + $0x170] ss:$8 sps:$4 sm:$0xff]   ;;  %v1353_v35 = vld [vmem:[%s1609_s24 + $0x184] ss:$8 sps:$4 sm:$0xff]   ;;  %v1356_v37 = vld [vmem:[%s1609_s24 + $0x180] ss:$8 sps:$4 sm:$0xff]  }
  0x49   : > { %765 = vmatprep.subr.bf16.mxu1 %v1323_v15  ;;  %v1357_v38 = vld [vmem:[%s1609_s24 + $0x94] ss:$8 sps:$4 sm:$0xff]   ;;  %v1361_v40 = vld [vmem:[%s1609_s24 + $0x90] ss:$8 sps:$4 sm:$0xff]   ;;  %v1363_v42 = vld [vmem:[%s1609_s24 + $0xa4] ss:$8 sps:$4 sm:$0xff]  }
  0x4a   : > { %v1359_v39 = vld [vmem:[%s1609_s24 + $0x194] ss:$8 sps:$4 sm:$0xff]   ;;  %v1362_v41 = vld [vmem:[%s1609_s24 + $0x190] ss:$8 sps:$4 sm:$0xff]   ;;  %v1365_v43 = vld [vmem:[%s1609_s24 + $0x1a4] ss:$8 sps:$4 sm:$0xff]  }
  0x4b   : > { %725 = vmatpush1.bf16.msra.mxu0 %v1325_v16  ;;  %v1367_v44 = vld [vmem:[%s1609_s24 + $0xa0] ss:$8 sps:$4 sm:$0xff]   ;;  %v1369_v46 = vld [vmem:[%s1609_s24 + $0xb4] ss:$8 sps:$4 sm:$0xff]   ;;  %v1373_v51 = vld [vmem:[%s1609_s24 + $0xb0] ss:$8 sps:$4 sm:$0xff]  }
  0x4c   : > { %766 = vmatpush1.bf16.msra.mxu1 %v1326_v17  ;;  %726 = vmatprep.subr.bf16.mxu0 %v1327_v18  ;;  %v1368_v45 = vld [vmem:[%s1609_s24 + $0x1a0] ss:$8 sps:$4 sm:$0xff]   ;;  %v1371_v47 = vld [vmem:[%s1609_s24 + $0x1b4] ss:$8 sps:$4 sm:$0xff]   ;;  %v1374_v52 = vld [vmem:[%s1609_s24 + $0x1b0] ss:$8 sps:$4 sm:$0xff]  }
  0x4d   : > { %767 = vmatprep.subr.bf16.mxu1 %v1329_v19  ;;  %v318_v48 = vld [vmem:[%s1619_s20] sm:$0xff]  ;;  %v319_v50 = vld [vmem:[%s1619_s20 + $0x8] sm:$0xff]  ;;  %v1379_v56 = vld [vmem:[%s1609_s24 + $0xc0] ss:$8 sps:$4 sm:$0xff]   ;;  %p1160_p7 = scmp.ne.s32.totalorder %s1542_s6, 3 }
  0x4e   : > { %v1093_v49 = vcombine.high %v318_v48, %v318_v48  ;;  %v1095_v53 = vcombine.high %v319_v50, %v319_v50  ;;  %v1375_v54 = vld [vmem:[%s1609_s24 + $0xc4] ss:$8 sps:$4 sm:$0xff]   ;;  %v1380_v57 = vld [vmem:[%s1609_s24 + $0x1c0] ss:$8 sps:$4 sm:$0xff]   ;;  %v1381_v58 = vld [vmem:[%s1609_s24 + $0xd4] ss:$8 sps:$4 sm:$0xff]   ;;  %v1092_v6 = vcombine.low %v318_v48, %v318_v48  ;;  %v1094_v7 = vcombine.low %v319_v50, %v319_v50 }
  0x4f   : > { %727 = vmatpush1.bf16.msra.mxu0 %v1331_v20  ;;  %v1377_v55 = vld [vmem:[%s1609_s24 + $0x1c4] ss:$8 sps:$4 sm:$0xff]   ;;  %v1383_v59 = vld [vmem:[%s1609_s24 + $0x1d4] ss:$8 sps:$4 sm:$0xff]   ;;  %v1385_v60 = vld [vmem:[%s1609_s24 + $0xd0] ss:$8 sps:$4 sm:$0xff]  }
  0x50   : > { %768 = vmatpush1.bf16.msra.mxu1 %v1332_v21  ;;  %728 = vmatprep.subr.bf16.mxu0 %v1333_v22  ;;  %v1386_v61 = vld [vmem:[%s1609_s24 + $0x1d0] ss:$8 sps:$4 sm:$0xff]   ;;  %v1387_v62 = vld [vmem:[%s1609_s24 + $0xe4] ss:$8 sps:$4 sm:$0xff]   ;;  %v1391_v0 = vld [vmem:[%s1609_s24 + $0xe0] ss:$8 sps:$4 sm:$0xff]  }
  0x51   : > { %769 = vmatprep.subr.bf16.mxu1 %v1335_v23  ;;  %750 = vmatprep.mubr.bf16.mxu0 %v1093_v49  ;;  %v1389_v63 = vld [vmem:[%s1609_s24 + $0x1e4] ss:$8 sps:$4 sm:$0xff]   ;;  %v1392_v1 = vld [vmem:[%s1609_s24 + $0x1e0] ss:$8 sps:$4 sm:$0xff]   ;;  %v1393_v2 = vld [vmem:[%s1609_s24 + $0xf4] ss:$8 sps:$4 sm:$0xff]  }
  0x52   : > { %791 = vmatprep.mubr.bf16.mxu1 %v1095_v53  ;;  %v1395_v3 = vld [vmem:[%s1609_s24 + $0x1f4] ss:$8 sps:$4 sm:$0xff]   ;;  %v1397_v4 = vld [vmem:[%s1609_s24 + $0xf0] ss:$8 sps:$4 sm:$0xff]   ;;  %vm1478_vm0 = vmmov (!%p1160_p7), 0   ;;  %vm947_vm1 = vcmask (!%p1160_p7), 261120  }
  0x53   : > { %729 = vmatpush1.bf16.msra.mxu0 %v1337_v24  ;;  %v1398_v5 = vld [vmem:[%s1609_s24 + $0x1f0] ss:$8 sps:$4 sm:$0xff]   ;;  %vm1027_vm2 = vcmask (!%p1160_p7), 7168  }
  0x54   : > { %770 = vmatpush1.bf16.msra.mxu1 %v1338_v25  ;;  %730 = vmatprep.subr.bf16.mxu0 %v1339_v26  ;;  %v316_v9 = vld [vmem:[#allocation2] sm:$0xff]  ;;  %v317_v13 = vld [vmem:[#allocation2 + $0x8] sm:$0xff]  ;;  %v812_v25 = vlaneseq (!%p1160_p7) }
  0x55   : > { %771 = vmatprep.subr.bf16.mxu1 %v1341_v27  ;;  %v842_v22 = vld [vmem:[%s1822_s3 + $0x80] sm:$0xff] (!%p1160_p7)  ;;  %v843_v23 = vld [vmem:[%s1822_s3 + $0x88] sm:$0xff] (!%p1160_p7) }
  0x56   : > { %v826_v24 = vld [vmem:[%s1822_s3] sm:$0xff] (!%p1160_p7)  ;;  %v1220_v26 = vpack.c.bf16 (!%p1160_p7), %v843_v23, %v842_v22  ;;  %v827_v27 = vld [vmem:[%s1822_s3 + $0x8] sm:$0xff] (!%p1160_p7)  ;;  %v1477_v22 = vmov (!%p1160_p7), 0.0|0.0   ;;  %v938_v23 = vld [vmem:[%s1824_s5 + $0x10] sm:$0xff] (!%p1160_p7) }
  0x57   : > { %731 = vmatpush1.bf16.msra.mxu0 %v1343_v28  ;;  %v844_v28 = vld [vmem:[%s1822_s3 + $0x90] sm:$0xff] (!%p1160_p7)  ;;  %v850_v48 = vld [vmem:[%s1822_s3 + $0xc0] sm:$0xff] (!%p1160_p7)  ;;  %v851_v49 = vld [vmem:[%s1822_s3 + $0xc8] sm:$0xff] (!%p1160_p7) }
  0x58   : > { %772 = vmatpush1.bf16.msra.mxu1 %v1344_v29  ;;  %732 = vmatprep.subr.bf16.mxu0 %v1345_v30  ;;  %v845_v29 = vld [vmem:[%s1822_s3 + $0x98] sm:$0xff] (!%p1160_p7)  ;;  %v1222_v30 = vpack.c.bf16 (!%p1160_p7), %v827_v27, %v826_v24 }
  0x59   : > { %773 = vmatprep.subr.bf16.mxu1 %v1347_v31  ;;  %v1224_v31 = vpack.c.bf16 (!%p1160_p7), %v845_v29, %v844_v28  ;;  %v939_v24 = vld [vmem:[%s1824_s5 + $0x18] sm:$0xff] (!%p1160_p7)  ;;  %v1161_v28 = vld [vmem:[%s1823_s4] ss:$0 sm:$0xff] (!%p1160_p7) }
  0x5b   : > { %733 = vmatpush1.bf16.msra.mxu0 %v1349_v32  ;;  %v828_v32 = vld [vmem:[%s1822_s3 + $0x10] sm:$0xff] (!%p1160_p7) }
  0x5c   : > { %774 = vmatpush1.bf16.msra.mxu1 %v1350_v33  ;;  %734 = vmatprep.subr.bf16.mxu0 %v1351_v34  ;;  %v829_v33 = vld [vmem:[%s1822_s3 + $0x18] sm:$0xff] (!%p1160_p7)  ;;  %v846_v34 = vld [vmem:[%s1822_s3 + $0xa0] sm:$0xff] (!%p1160_p7) }
  0x5d   : > { %775 = vmatprep.subr.bf16.mxu1 %v1353_v35  ;;  %v847_v35 = vld [vmem:[%s1822_s3 + $0xa8] sm:$0xff] (!%p1160_p7) }
  0x5f   : > { %735 = vmatpush1.bf16.msra.mxu0 %v1355_v36  ;;  %v1226_v36 = vpack.c.bf16 (!%p1160_p7), %v829_v33, %v828_v32  ;;  %v1162_v33 = vld [vmem:[#allocation3] ss:$0 sm:$0xff] (!%p1160_p7) }
  0x60   : > { %776 = vmatpush1.bf16.msra.mxu1 %v1356_v37  ;;  %736 = vmatprep.subr.bf16.mxu0 %v1357_v38  ;;  %v813_v37 = vshrl.u32 (!%p1160_p7), %v812_v25, 7  ;;  %v1228_v38 = vpack.c.bf16 (!%p1160_p7), %v847_v35, %v846_v34  ;;  %v1256_v25 = vpack.c.bf16 (!%p1160_p7), %v939_v24, %v938_v23 }
  0x61   : > { %777 = vmatprep.subr.bf16.mxu1 %v1359_v39  ;;  %v830_v39 = vld [vmem:[%s1822_s3 + $0x20] sm:$0xff] (!%p1160_p7) }
  0x63   : > { %737 = vmatpush1.bf16.msra.mxu0 %v1361_v40  ;;  %v831_v40 = vld [vmem:[%s1822_s3 + $0x28] sm:$0xff] (!%p1160_p7) }
  0x64   : > { %778 = vmatpush1.bf16.msra.mxu1 %v1362_v41  ;;  %738 = vmatprep.subr.bf16.mxu0 %v1363_v42  ;;  %v848_v41 = vld [vmem:[%s1822_s3 + $0xb0] sm:$0xff] (!%p1160_p7)  ;;  %v849_v42 = vld [vmem:[%s1822_s3 + $0xb8] sm:$0xff] (!%p1160_p7) }
  0x65   : > { %779 = vmatprep.subr.bf16.mxu1 %v1365_v43  ;;  %v1230_v43 = vpack.c.bf16 (!%p1160_p7), %v831_v40, %v830_v39 }
  0x67   : > { %739 = vmatpush1.bf16.msra.mxu0 %v1367_v44  ;;  %v818_v44 = vsub.s32 (!%p1160_p7), 1, %v813_v37 }
  0x68   : > { %780 = vmatpush1.bf16.msra.mxu1 %v1368_v45  ;;  %740 = vmatprep.subr.bf16.mxu0 %v1369_v46  ;;  %v1232_v45 = vpack.c.bf16 (!%p1160_p7), %v849_v42, %v848_v41  ;;  %v832_v46 = vld [vmem:[%s1822_s3 + $0x30] sm:$0xff] (!%p1160_p7) }
  0x69   : > { %781 = vmatprep.subr.bf16.mxu1 %v1371_v47  ;;  %v833_v47 = vld [vmem:[%s1822_s3 + $0x38] sm:$0xff] (!%p1160_p7) }
  0x6b   : > { %741 = vmatpush1.bf16.msra.mxu0 %v1373_v51  ;;  %v810_v51 = vld [vmem:[%s1821_s2] sm:$0x3] (!%p1160_p7) }
  0x6c   : > { %782 = vmatpush1.bf16.msra.mxu1 %v1374_v52  ;;  %742 = vmatprep.subr.bf16.mxu0 %v1375_v54  ;;  %v1234_v52 = vpack.c.bf16 (!%p1160_p7), %v833_v47, %v832_v46  ;;  %v819_v53 = vrot.slane (!%p1160_p7), %v810_v51, %v818_v44  ;;  %v1236_v54 = vpack.c.bf16 (!%p1160_p7), %v851_v49, %v850_v48 }
  0x6d   : > { %783 = vmatprep.subr.bf16.mxu1 %v1377_v55  ;;  %v834_v55 = vld [vmem:[%s1822_s3 + $0x40] sm:$0xff] (!%p1160_p7) }
  0x6f   : > { %743 = vmatpush1.bf16.msra.mxu0 %v1379_v56  ;;  %v835_v56 = vld [vmem:[%s1822_s3 + $0x48] sm:$0xff] (!%p1160_p7) }
  0x70   : > { %784 = vmatpush1.bf16.msra.mxu1 %v1380_v57  ;;  %744 = vmatprep.subr.bf16.mxu0 %v1381_v58  ;;  %v852_v57 = vld [vmem:[%s1822_s3 + $0xd0] sm:$0xff] (!%p1160_p7)  ;;  %v853_v58 = vld [vmem:[%s1822_s3 + $0xd8] sm:$0xff] (!%p1160_p7) }
  0x71   : > { %785 = vmatprep.subr.bf16.mxu1 %v1383_v59 }
  0x73   : > { %745 = vmatpush1.bf16.msra.mxu0 %v1385_v60  ;;  %v1238_v60 = vpack.c.bf16 (!%p1160_p7), %v835_v56, %v834_v55 }
  0x74   : > { %786 = vmatpush1.bf16.msra.mxu1 %v1386_v61  ;;  %746 = vmatprep.subr.bf16.mxu0 %v1387_v62  ;;  %v1240_v62 = vpack.c.bf16 (!%p1160_p7), %v853_v58, %v852_v57 }
  0x75   : > { %787 = vmatprep.subr.bf16.mxu1 %v1389_v63  ;;  %v836_v63 = vld [vmem:[%s1822_s3 + $0x50] sm:$0xff] (!%p1160_p7) }
  0x77   : > { %747 = vmatpush1.bf16.msra.mxu0 %v1391_v0  ;;  %v837_v0 = vld [vmem:[%s1822_s3 + $0x58] sm:$0xff] (!%p1160_p7) }
  0x78   : > { %788 = vmatpush1.bf16.msra.mxu1 %v1392_v1  ;;  %748 = vmatprep.subr.bf16.mxu0 %v1393_v2  ;;  %v854_v1 = vld [vmem:[%s1822_s3 + $0xe0] sm:$0xff] (!%p1160_p7)  ;;  %v855_v2 = vld [vmem:[%s1822_s3 + $0xe8] sm:$0xff] (!%p1160_p7) }
  0x79   : > { %789 = vmatprep.subr.bf16.mxu1 %v1395_v3  ;;  %v814_v3 = vsub.s32 (!%p1160_p7), 0, %v813_v37 }
  0x7b   : > { %749 = vmatpush1.bf16.msra.mxu0 %v1397_v4  ;;  %v1242_v4 = vpack.c.bf16 (!%p1160_p7), %v837_v0, %v836_v63 }
  0x7c   : > { %790 = vmatpush1.bf16.msra.mxu1 %v1398_v5  ;;  %1221 = vmatprep.subr.bf16.mxu0 (!%p1160_p7), %v1220_v26  ;;  %v1244_v5 = vpack.c.bf16 (!%p1160_p7), %v855_v2, %v854_v1  ;;  %v1479_v26 = vmov (!%p1160_p7), 0.0  }
  0x7d   : > { %1252 = vmatprep.subr.bf16.mxu1 (!%p1160_p7), %v1477_v22 }
  0x7e   : > { %751 = vmatmul.mubr.bf16.vlgmr.msra.gmra.mrb[0].mxu0 %v1092_v6  ;;  %v838_v6 = vld [vmem:[%s1822_s3 + $0x60] sm:$0xff] (!%p1160_p7) }
  0x7f   : > { %792 = vmatmul.mubr.bf16.vlgmr.msra.gmra.mrb[0].mxu1 %v1094_v7  ;;  %1223 = vmatpush3.bf16.msra.mxu0 (!%p1160_p7), %v1222_v30  ;;  %v839_v7 = vld [vmem:[%s1822_s3 + $0x68] sm:$0xff] (!%p1160_p7) }
  0x80   : > { %1225 = vmatprep.subr.bf16.mxu0 (!%p1160_p7), %v1224_v31  ;;  %1217 = vmatprep.mubr.msk.f32.mxu1 (!%p1160_p7), %vm1478_vm0, %v1479_v26 }
  0x83   : > { %1227 = vmatpush3.bf16.msra.mxu0 (!%p1160_p7), %v1226_v36 }
  0x84   : > { %1229 = vmatprep.subr.bf16.mxu0 (!%p1160_p7), %v1228_v38 }
  0x87   : > { %1231 = vmatpush3.bf16.msra.mxu0 (!%p1160_p7), %v1230_v43 }
  0x88   : > { %1233 = vmatprep.subr.bf16.mxu0 (!%p1160_p7), %v1232_v45 }
  0x8b   : > { %1235 = vmatpush3.bf16.msra.mxu0 (!%p1160_p7), %v1234_v52 }
  0x8c   : > { %1237 = vmatprep.subr.bf16.mxu0 (!%p1160_p7), %v1236_v54 }
  0x8f   : > { %1239 = vmatpush3.bf16.msra.mxu0 (!%p1160_p7), %v1238_v60 }
  0x90   : > { %1241 = vmatprep.subr.bf16.mxu0 (!%p1160_p7), %v1240_v62 }
  0x93   : > { %1243 = vmatpush3.bf16.msra.mxu0 (!%p1160_p7), %v1242_v4 }
  0x94   : > { %1245 = vmatprep.subr.bf16.mxu0 (!%p1160_p7), %v1244_v5 }
 0x151   : > { %v752_v8 = vpop.f32.mrb[0].mxu0 }
 0x152   : > { %v793_v10 = vpop.f32.mrb[0].mxu1  ;;  %v754_v12 = vpop.f32.mrb[1].mxu0  ;;  %807 = sbr.rel (%p1160_p7) target bundleno = 817 (0x331), region = 60 }
 0x153   : > { %v794_v11 = vadd.f32 %v793_v10, %v752_v8  ;;  %v795_v14 = vpop.f32.mrb[1].mxu1  ;;  %v756_v16 = vpop.f32.mrb[2].mxu0  ;;  %v856_v8 = vld [vmem:[%s1822_s3 + $0xf0] sm:$0xff] (!%p1160_p7)  ;;  %v815_v10 = vrot.slane (!%p1160_p7), %v810_v51, %v814_v3 }
 0x154   : > { %v796_v15 = vadd.f32 %v795_v14, %v754_v12  ;;  %v797_v17 = vpop.f32.mrb[2].mxu1  ;;  %v757_v19 = vpop.f32.mrb[3].mxu0  ;;  %v840_v14 = vld [vmem:[%s1822_s3 + $0x70] sm:$0xff] (!%p1160_p7) }
 0x155   : > { %v800_v18 = vadd.f32 %v794_v11, %v316_v9  ;;  %v798_v20 = vpop.f32.mrb[3].mxu1  ;;  %v857_v9 = vld [vmem:[%s1822_s3 + $0xf8] sm:$0xff] (!%p1160_p7)  ;;  %v1246_v11 = vpack.c.bf16 (!%p1160_p7), %v839_v7, %v838_v6  ;;  %v936_v19 = vld [vmem:[%s1824_s5] sm:$0xff] (!%p1160_p7) }
 0x156   : > { %v801_v21 = vadd.f32 %v796_v15, %v317_v13  ;;  %v1248_v13 = vpack.c.bf16 (!%p1160_p7), %v857_v9, %v856_v8  ;;  %v841_v15 = vld [vmem:[%s1822_s3 + $0x78] sm:$0xff] (!%p1160_p7)  ;;  %v937_v20 = vld [vmem:[%s1824_s5 + $0x8] sm:$0xff] (!%p1160_p7) }
 0x157   : > { %802 = vst [vmem:[#allocation2] sm:$0xff] %v800_v18  ;;  %1247 = vmatpush3.bf16.msra.mxu0 (!%p1160_p7), %v1246_v11  ;;  %v1250_v17 = vpack.c.bf16 (!%p1160_p7), %v841_v15, %v840_v14 }
 0x158   : > { %803 = vst [vmem:[#allocation2 + $0x8] sm:$0xff] %v801_v21  ;;  %1249 = vmatprep.subr.bf16.mxu0 (!%p1160_p7), %v1248_v13  ;;  %v1253_v21 = vpack.c.bf16 (!%p1160_p7), %v937_v20, %v936_v19 }
 0x15a   : > { %1254 = vmatpush3.bf16.msra.mxu1 %v1253_v21 }
 0x15b   : > { %1251 = vmatpush3.bf16.msra.mxu0 %v1250_v17  ;;  %1255 = vmatprep.subr.bf16.mxu1 %v1477_v22 }
 0x15e   : > { %v808_v12 = vld [vmem:[#allocation2] sm:$0xff]  ;;  %1257 = vmatpush3.bf16.msra.mxu1 %v1256_v25 }
 0x15f   : > { %v809_v50 = vld [vmem:[#allocation2 + $0x8] sm:$0xff]  ;;  %v822_v16 = vadd.f32 %v815_v10, %v808_v12 }
 0x160   : > { %v823_v59 = vadd.f32 %v819_v53, %v809_v50 }
 0x161   : > { %v824_v18 = vmax.f32 %v822_v16, 0.0 }
 0x162   : > { %v825_v61 = vmax.f32 %v823_v59, 0.0 }
 0x164   : > { %929 = vmatprep.mubr.f32.mxu0 %v825_v61 }
 0x165   : > { %930 = vmatmul.mubr.f32.vlgmr.msra.gmra.mrb[0].mxu0 %v824_v18 }
 0x238   : > { %v1201_v27 = vpop.f32.mrb[0].mxu0 }
 0x239   : > { %v1202_v29 = vpop.f32.mrb[1].mxu0 }
 0x23a   : > { %v1203_v30 = vadd.f32 %v1202_v29, %v1201_v27 }
 0x23c   : > { %v932_v31 = vadd.f32 %v1203_v30, %v1161_v28 }
 0x23e   : > { %v935_v32 = vmax.f32 %v932_v31, 0.0 }
 0x240   : > { %1218 = vmatmul.mubr.msk.f32.vlgmr.msra.gmra.mrb[0].mxu1 %vm947_vm1, %v935_v32 }
 0x313   : > { %v1017_v34 = vpop.f32.mrb[0].mxu1 }
 0x314   : > { %v1018_v35 = vadd.f32 %v1162_v33, %v1017_v34  ;;  %v1219_v36 = vpop.f32.mrb[1].mxu1 }
 0x316   : > { %v1164_v37 = vmul.f32 -1.442695, %v1018_v35 }
 0x318   : > { %1403 = vpow2.f32 %v1164_v37 }
 0x322   : > { %v1404_v38 = vpop.eup %1403 }
 0x323   : > { %v1024_v39 = vadd.f32 1.0, %v1404_v38 }
 0x325   : > { %1405 = vrcp.f32 %v1024_v39 }
 0x32f   : > { %v1406_v40 = vpop.eup %1405 }
 0x330   : > { %1028 = vst.msk [vmem:[%s1826_s7] sm:$0xff] %vm1027_vm2, %v1406_v40 }
 0x331 PF: > { %p19_p4 = scmp.ge.s32.totalorder %s1545_s30, 6   ;;  %s1830_s26 = smov %s1463_s27 }
 0x332   : > { %s1831_s27 = smov %s1467_s28  ;;  %s1832_s28 = smov %s1555_s10 }
 0x333   : > { %s1833_s29 = smov %s1545_s30  ;;  %21 = sbr.rel (!%p19_p4) target bundleno = 6 (0x6), region = 95 }
 0x33a   :  { %1040 = vsyncpa [#allocation5], 1 }
 0x33b   :  { %1042 = vsyncpa [#allocation5 + $0x1], 1 }

</bundles_post_ra>
